<compile_context>
chip_gen: v7x
topology: tpu7x:2x2x1
jax: 0.10.0
libtpu: 0.0.40
codegen_flags: <defaults>
</compile_context>

<pallas_src>
import jax
import jax.numpy as jnp
from jax.experimental import pallas as pl
from jax.experimental.pallas import tpu as pltpu


LANE = 128      # TPU lane width: every feature axis padded to a multiple of this
SUBLANE_BF16 = 16   # bf16 packs two rows per sublane -> batch tile multiple of 16


def _round_up(x, m):
    return (x + m - 1) // m * m


def _cdiv(a, b):
    return -(-a // b)


def _pick_tk(in_p, tk_cap):
    """Largest multiple of LANE that divides in_p and is <= tk_cap."""
    m = in_p // LANE
    d_cap = max(1, tk_cap // LANE)
    best = 1
    for d in range(1, min(m, d_cap) + 1):
        if m % d == 0:
            best = d
    return best * LANE


def clsnet_kernel(x_ref, we_ref, be_ref, w1_ref, b1_ref, w2_ref, b2_ref,
                  wh_ref, bh_ref, emb_ref, logits_ref, acc_ref):
    """Grid = (batch tile i, encoder-K tile k).

    Encoder matmul is accumulated over k into an f32 VMEM scratch; on the last k
    step the bias+ReLU, the 2-layer MLP and the head run and the outputs are stored.
    Matmul inputs are bf16, accumulation f32.
    """
    k = pl.program_id(1)

    @pl.when(k == 0)
    def _():
        acc_ref[...] = jnp.zeros_like(acc_ref)

    # encoder partial product for this K slice: (tb, tk) @ (tk, FEAT_P) -> f32
    acc_ref[...] += jnp.dot(x_ref[...], we_ref[...],
                            preferred_element_type=jnp.float32)

    @pl.when(k == pl.num_programs(1) - 1)
    def _():
        # encoder: bias + ReLU
        f = jnp.maximum(acc_ref[...] + be_ref[...], 0.0).astype(jnp.bfloat16)

        # emb_net layer 1: Linear + ReLU
        h = jnp.dot(f, w1_ref[...], preferred_element_type=jnp.float32) + b1_ref[...]
        h = jnp.maximum(h, 0.0).astype(jnp.bfloat16)

        # emb_net layer 2: Linear (embedding output, no activation)
        e = jnp.dot(h, w2_ref[...], preferred_element_type=jnp.float32) + b2_ref[...]
        e_bf = e.astype(jnp.bfloat16)
        emb_ref[...] = e_bf                           # bf16 writeback (padded lanes)

        # head: Linear
        logits_ref[...] = (
            jnp.dot(e_bf, wh_ref[...], preferred_element_type=jnp.float32)
            + bh_ref[...]
        )


def prepare_params(params):
    """One-time lane-padding + bf16 cast of all weights/biases (hoisted out of forward)."""
    we, be, w1, b1, w2, b2, wh, bh = params
    in_dim, feat = we.shape
    h1 = w1.shape[1]
    emb = w2.shape[1]
    n_cls = wh.shape[1]

    in_p = _round_up(in_dim, LANE)
    feat_p = _round_up(feat, LANE)
    h1_p = _round_up(h1, LANE)
    emb_p = _round_up(emb, LANE)
    ncls_p = _round_up(n_cls, LANE)

    def pad2(a, rows, cols, dtype):
        return jnp.pad(a, ((0, rows - a.shape[0]), (0, cols - a.shape[1]))).astype(dtype)

    padded = dict(
        we=pad2(we, in_p, feat_p, jnp.bfloat16),
        be=pad2(be, 1, feat_p, jnp.float32),
        w1=pad2(w1, feat_p, h1_p, jnp.bfloat16),
        b1=pad2(b1, 1, h1_p, jnp.float32),
        w2=pad2(w2, h1_p, emb_p, jnp.bfloat16),
        b2=pad2(b2, 1, emb_p, jnp.float32),
        wh=pad2(wh, emb_p, ncls_p, jnp.bfloat16),
        bh=pad2(bh, 1, ncls_p, jnp.float32),
    )
    dims = dict(in_dim=in_dim, feat=feat, h1=h1, emb=emb, n_cls=n_cls,
                in_p=in_p, feat_p=feat_p, h1_p=h1_p, emb_p=emb_p, ncls_p=ncls_p)
    return padded, dims


def clsnet_forward(image, prepared, *, batch_tile=512, k_tile=None):
    """image: (B, C, H, W) float32. Returns (embeddings (B, EMB) f32, logits (B, N_CLS) f32)."""
    padded, d = prepared
    B = image.shape[0]
    x = image.reshape(B, -1)                       # glue: flatten NCHW row-major

    in_dim, in_p = d["in_dim"], d["in_p"]
    feat_p, h1_p, emb_p, ncls_p = d["feat_p"], d["h1_p"], d["emb_p"], d["ncls_p"]

    # --- batch tiling: adaptive tb (multiple of 16 for dense bf16 sublane packing),
    #     chosen so a ragged batch does not run a mostly-zero final tile ---
    nb = max(1, _cdiv(B, batch_tile))
    tb = _round_up(_cdiv(B, nb), SUBLANE_BF16)
    b_p = _round_up(B, tb)
    n_bt = b_p // tb

    # --- encoder K tiling: keep 2x(tb,tk) + 2x(tk,feat_p) bf16 buffers ~<= 24 MiB ---
    if k_tile is None:
        budget = 24 * 1024 * 1024
        tk_cap = max(LANE, budget // (2 * 2 * (tb + feat_p)))
    else:
        tk_cap = max(LANE, int(k_tile))
    tk = _pick_tk(in_p, tk_cap)
    nk = in_p // tk

    # per-call padding of x only (weights were prepared once)
    xp = jnp.pad(x, ((0, b_p - B), (0, in_p - in_dim))).astype(jnp.bfloat16)

    def resident_spec(shape):
        # constant block index + single pipeline buffer: DMA'd once, 1x VMEM footprint
        return pl.BlockSpec(shape, lambda i, k: (0, 0), pipeline_mode=pl.Buffered(1))

    in_specs = [
        pl.BlockSpec((tb, tk), lambda i, k: (i, k)),        # x: streamed over batch & K
        pl.BlockSpec((tk, feat_p), lambda i, k: (k, 0)),    # encoder weight: streamed over K
        resident_spec(padded["be"].shape),
        resident_spec(padded["w1"].shape), resident_spec(padded["b1"].shape),
        resident_spec(padded["w2"].shape), resident_spec(padded["b2"].shape),
        resident_spec(padded["wh"].shape), resident_spec(padded["bh"].shape),
    ]
    out_specs = (
        pl.BlockSpec((tb, emb_p), lambda i, k: (i, 0)),
        pl.BlockSpec((tb, ncls_p), lambda i, k: (i, 0)),
    )
    out_shape = (
        jax.ShapeDtypeStruct((b_p, emb_p), jnp.bfloat16),   # bf16 writeback, upcast outside
        jax.ShapeDtypeStruct((b_p, ncls_p), jnp.float32),
    )

    args = (xp, padded["we"], padded["be"], padded["w1"], padded["b1"],
            padded["w2"], padded["b2"], padded["wh"], padded["bh"])

    # --- real VMEM footprint -> vmem_limit with per-generation headroom ---
    resident_bytes = sum(int(padded[n].size) * padded[n].dtype.itemsize
                         for n in ("be", "w1", "b1", "w2", "b2", "wh", "bh"))
    pipelined_bytes = 2 * (tb * tk * 2 + tk * feat_p * 2)        # x + we, bf16, 2 bufs
    output_bytes = 2 * (tb * emb_p * 2 + tb * ncls_p * 4)        # 2 bufs each
    scratch_bytes = tb * feat_p * 4
    footprint = resident_bytes + pipelined_bytes + output_bytes + scratch_bytes
    try:
        vmem_cap = int(pltpu.get_tpu_info().vmem_capacity_bytes)
    except Exception:
        vmem_cap = 64 * 1024 * 1024
    cap = min(100 * 1024 * 1024, (vmem_cap * 7) // 8)            # ~56 MiB on v7x, ~100 MiB v5e/v6e
    vmem_limit = min(max(footprint + 8 * 1024 * 1024, 32 * 1024 * 1024), cap)

    flops = 2 * b_p * (in_p * feat_p + feat_p * h1_p + h1_p * emb_p + emb_p * ncls_p)
    bytes_accessed = (int(xp.size) * 2
                      + sum(int(v.size) * v.dtype.itemsize for v in padded.values())
                      + b_p * emb_p * 2 + b_p * ncls_p * 4)

    emb_pad, logits_pad = pl.pallas_call(
        clsnet_kernel,
        grid=(n_bt, nk),
        in_specs=in_specs,
        out_specs=out_specs,
        out_shape=out_shape,
        scratch_shapes=[pltpu.VMEM((tb, feat_p), jnp.float32)],
        compiler_params=pltpu.CompilerParams(
            # batch tiles independent -> megacore sharding; K is a reduction -> arbitrary
            dimension_semantics=("parallel", "arbitrary"),
            vmem_limit_bytes=int(vmem_limit),
        ),
        cost_estimate=pl.CostEstimate(
            flops=flops, transcendentals=0, bytes_accessed=bytes_accessed),
    )(*args)

    # Slice padded lanes/rows off; upcast embeddings back to f32 outside the kernel.
    return (emb_pad[:B, :d["emb"]].astype(jnp.float32),
            logits_pad[:B, :d["n_cls"]])


def init_params(key, in_dim, feat, h1, emb, n_cls):
    """Deterministic synthetic weights, stored as (in, out) = PyTorch Linear W.T."""
    ks = jax.random.split(key, 8)

    def lin(kw, kb, fan_in, fan_out):
        s = float(fan_in) ** -0.5
        w = jax.random.normal(kw, (fan_in, fan_out), jnp.float32) * s
        b = jax.random.normal(kb, (1, fan_out), jnp.float32) * 0.1
        return w, b

    we, be = lin(ks[0], ks[1], in_dim, feat)
    w1, b1 = lin(ks[2], ks[3], feat, h1)
    w2, b2 = lin(ks[4], ks[5], h1, emb)
    wh, bh = lin(ks[6], ks[7], emb, n_cls)
    return (we, be, w1, b1, w2, b2, wh, bh)


def reference_forward(image, params):
    """Pure-JAX reference mirroring the kernel numerics (bf16 matmul inputs, f32 accum)."""
    we, be, w1, b1, w2, b2, wh, bh = params
    bf = jnp.bfloat16
    x = image.reshape(image.shape[0], -1).astype(bf)
    f = jnp.maximum(jnp.dot(x, we.astype(bf), preferred_element_type=jnp.float32) + be, 0.0)
    h = jnp.maximum(jnp.dot(f.astype(bf), w1.astype(bf),
                            preferred_element_type=jnp.float32) + b1, 0.0)
    e = jnp.dot(h.astype(bf), w2.astype(bf), preferred_element_type=jnp.float32) + b2
    logits = jnp.dot(e.astype(bf), wh.astype(bf), preferred_element_type=jnp.float32) + bh
    return e, logits


if __name__ == "__main__":
    # Small shapes consistent with the forward: image (B=2, C=4, H=16, W=16).
    # k_tile=512 on in_dim=1024 exercises the 2-step encoder K reduction.
    B, C, H, W = 2, 4, 16, 16
    FEAT, H1, EMB, N_CLS = 64, 32, 16, 10

    key = jax.random.PRNGKey(0)
    k_img, k_par = jax.random.split(key)
    image = jax.random.normal(k_img, (B, C, H, W), jnp.float32)
    params = init_params(k_par, C * H * W, FEAT, H1, EMB, N_CLS)

    prepared = prepare_params(params)   # one-time pad/cast, hoisted out of the forward path

    fwd = jax.jit(lambda img: clsnet_forward(img, prepared, batch_tile=512, k_tile=512))
    emb, logits = fwd(image)
    emb = jax.block_until_ready(emb)
    logits = jax.block_until_ready(logits)

    emb_ref, logits_ref = reference_forward(image, params)
    assert emb.shape == (B, EMB) and logits.shape == (B, N_CLS)
    # embeddings are written back in bf16 -> tolerance covers one bf16 rounding step
    assert jnp.allclose(emb, emb_ref, atol=2e-2, rtol=2e-2), \
        float(jnp.max(jnp.abs(emb - emb_ref)))
    assert jnp.allclose(logits, logits_ref, atol=2e-2, rtol=2e-2), \
        float(jnp.max(jnp.abs(logits - logits_ref)))

    print("KERNEL_OK")
</pallas_src>

<mosaic_0001>
module attributes {stable_mosaic.version = 11 : i64} {
  func.func @clsnet_kernel(%arg0: i32, %arg1: i32, %arg2: memref<16x512xbf16, #tpu.memory_space<vmem>>, %arg3: memref<512x128xbf16, #tpu.memory_space<vmem>>, %arg4: memref<1x128xf32, #tpu.memory_space<vmem>>, %arg5: memref<128x128xbf16, #tpu.memory_space<vmem>>, %arg6: memref<1x128xf32, #tpu.memory_space<vmem>>, %arg7: memref<128x128xbf16, #tpu.memory_space<vmem>>, %arg8: memref<1x128xf32, #tpu.memory_space<vmem>>, %arg9: memref<128x128xbf16, #tpu.memory_space<vmem>>, %arg10: memref<1x128xf32, #tpu.memory_space<vmem>>, %arg11: memref<16x128xbf16, #tpu.memory_space<vmem>>, %arg12: memref<16x128xf32, #tpu.memory_space<vmem>>, %arg13: memref<16x128xf32, #tpu.memory_space<vmem>>) attributes {dimension_semantics = [#tpu.dimension_semantics<parallel>, #tpu.dimension_semantics<arbitrary>], iteration_bounds = array<i64: 1, 2>, scalar_prefetch = 0 : i64, scratch_operands = 1 : i64, tpu.core_type = #tpu.core_type<tc>, window_params = [{transform_indices = @transform_0, window_bounds = array<i64: 16, 512>}, {transform_indices = @transform_1, window_bounds = array<i64: 512, 128>}, {pipeline_mode = #tpu.pipeline_mode<synchronous>, transform_indices = @transform_2, window_bounds = array<i64: 1, 128>}, {pipeline_mode = #tpu.pipeline_mode<synchronous>, transform_indices = @transform_3, window_bounds = array<i64: 128, 128>}, {pipeline_mode = #tpu.pipeline_mode<synchronous>, transform_indices = @transform_4, window_bounds = array<i64: 1, 128>}, {pipeline_mode = #tpu.pipeline_mode<synchronous>, transform_indices = @transform_5, window_bounds = array<i64: 128, 128>}, {pipeline_mode = #tpu.pipeline_mode<synchronous>, transform_indices = @transform_6, window_bounds = array<i64: 1, 128>}, {pipeline_mode = #tpu.pipeline_mode<synchronous>, transform_indices = @transform_7, window_bounds = array<i64: 128, 128>}, {pipeline_mode = #tpu.pipeline_mode<synchronous>, transform_indices = @transform_8, window_bounds = array<i64: 1, 128>}, {transform_indices = @transform_9, window_bounds = array<i64: 16, 128>}, {transform_indices = @transform_10, window_bounds = array<i64: 16, 128>}]} {
    %c0_i32 = arith.constant 0 : i32
    %0 = arith.cmpi eq, %arg1, %c0_i32 : i32
    %1 = arith.extui %0 : i1 to i32
    %c0_i32_0 = arith.constant 0 : i32
    %2 = arith.cmpi ne, %1, %c0_i32_0 : i32
    scf.if %2 {
      %cst_9 = arith.constant 0.000000e+00 : f32
      %12 = vector.broadcast %cst_9 : f32 to vector<16x128xf32>
      %c0_10 = arith.constant 0 : index
      %c0_11 = arith.constant 0 : index
      %13 = vector.load %arg13[%c0_10, %c0_11] : memref<16x128xf32, #tpu.memory_space<vmem>>, vector<16x128xf32>
      tpu.vector_store %arg13[%c0_10, %c0_11], %12 {strides = array<i32>} : memref<16x128xf32, #tpu.memory_space<vmem>>, vector<16x128xf32>,
    } else {
    }
    %c0 = arith.constant 0 : index
    %c0_1 = arith.constant 0 : index
    %3 = vector.load %arg13[%c0, %c0_1] : memref<16x128xf32, #tpu.memory_space<vmem>>, vector<16x128xf32>
    %c0_2 = arith.constant 0 : index
    %c0_3 = arith.constant 0 : index
    %4 = vector.load %arg2[%c0_2, %c0_3] : memref<16x512xbf16, #tpu.memory_space<vmem>>, vector<16x512xbf16>
    %c0_4 = arith.constant 0 : index
    %c0_5 = arith.constant 0 : index
    %5 = vector.load %arg3[%c0_4, %c0_5] : memref<512x128xbf16, #tpu.memory_space<vmem>>, vector<512x128xbf16>
    %cst = arith.constant dense<0.000000e+00> : vector<16x128xf32>
    %6 = tpu.matmul %4, %5, %cst {dimension_numbers = #tpu.dot_dimension_numbers<[1], [0], [0], [1], [0, 0, 1, 1], [], []>} : vector<16x512xbf16>, vector<512x128xbf16>, vector<16x128xf32> -> vector<16x128xf32>
    %7 = arith.addf %3, %6 : vector<16x128xf32>
    %c0_6 = arith.constant 0 : index
    %c0_7 = arith.constant 0 : index
    %8 = vector.load %arg13[%c0_6, %c0_7] : memref<16x128xf32, #tpu.memory_space<vmem>>, vector<16x128xf32>
    tpu.vector_store %arg13[%c0_6, %c0_7], %7 {strides = array<i32>} : memref<16x128xf32, #tpu.memory_space<vmem>>, vector<16x128xf32>,
    %c1_i32 = arith.constant 1 : i32
    %9 = arith.cmpi eq, %arg1, %c1_i32 : i32
    %10 = arith.extui %9 : i1 to i32
    %c0_i32_8 = arith.constant 0 : i32
    %11 = arith.cmpi ne, %10, %c0_i32_8 : i32
    scf.if %11 {
      %c0_9 = arith.constant 0 : index
      %c0_10 = arith.constant 0 : index
      %12 = vector.load %arg13[%c0_9, %c0_10] : memref<16x128xf32, #tpu.memory_space<vmem>>, vector<16x128xf32>
      %c0_11 = arith.constant 0 : index
      %c0_12 = arith.constant 0 : index
      %13 = vector.load %arg4[%c0_11, %c0_12] : memref<1x128xf32, #tpu.memory_space<vmem>>, vector<1x128xf32>
      %14 = vector.broadcast %13 : vector<1x128xf32> to vector<16x128xf32>
      %15 = arith.addf %12, %14 : vector<16x128xf32>
      %cst_13 = arith.constant 0.000000e+00 : f32
      %16 = vector.broadcast %cst_13 : f32 to vector<16x128xf32>
      %17 = arith.maximumf %15, %16 : vector<16x128xf32>
      %18 = arith.truncf %17 : vector<16x128xf32> to vector<16x128xbf16>
      %c0_14 = arith.constant 0 : index
      %c0_15 = arith.constant 0 : index
      %19 = vector.load %arg5[%c0_14, %c0_15] : memref<128x128xbf16, #tpu.memory_space<vmem>>, vector<128x128xbf16>
      %cst_16 = arith.constant dense<0.000000e+00> : vector<16x128xf32>
      %20 = tpu.matmul %18, %19, %cst_16 {dimension_numbers = #tpu.dot_dimension_numbers<[1], [0], [0], [1], [0, 0, 1, 1], [], []>} : vector<16x128xbf16>, vector<128x128xbf16>, vector<16x128xf32> -> vector<16x128xf32>
      %c0_17 = arith.constant 0 : index
      %c0_18 = arith.constant 0 : index
      %21 = vector.load %arg6[%c0_17, %c0_18] : memref<1x128xf32, #tpu.memory_space<vmem>>, vector<1x128xf32>
      %22 = vector.broadcast %21 : vector<1x128xf32> to vector<16x128xf32>
      %23 = arith.addf %20, %22 : vector<16x128xf32>
      %cst_19 = arith.constant 0.000000e+00 : f32
      %24 = vector.broadcast %cst_19 : f32 to vector<16x128xf32>
      %25 = arith.maximumf %23, %24 : vector<16x128xf32>
      %26 = arith.truncf %25 : vector<16x128xf32> to vector<16x128xbf16>
      %c0_20 = arith.constant 0 : index
      %c0_21 = arith.constant 0 : index
      %27 = vector.load %arg7[%c0_20, %c0_21] : memref<128x128xbf16, #tpu.memory_space<vmem>>, vector<128x128xbf16>
      %cst_22 = arith.constant dense<0.000000e+00> : vector<16x128xf32>
      %28 = tpu.matmul %26, %27, %cst_22 {dimension_numbers = #tpu.dot_dimension_numbers<[1], [0], [0], [1], [0, 0, 1, 1], [], []>} : vector<16x128xbf16>, vector<128x128xbf16>, vector<16x128xf32> -> vector<16x128xf32>
      %c0_23 = arith.constant 0 : index
      %c0_24 = arith.constant 0 : index
      %29 = vector.load %arg8[%c0_23, %c0_24] : memref<1x128xf32, #tpu.memory_space<vmem>>, vector<1x128xf32>
      %30 = vector.broadcast %29 : vector<1x128xf32> to vector<16x128xf32>
      %31 = arith.addf %28, %30 : vector<16x128xf32>
      %32 = arith.truncf %31 : vector<16x128xf32> to vector<16x128xbf16>
      %c0_25 = arith.constant 0 : index
      %c0_26 = arith.constant 0 : index
      %33 = vector.load %arg11[%c0_25, %c0_26] : memref<16x128xbf16, #tpu.memory_space<vmem>>, vector<16x128xbf16>
      tpu.vector_store %arg11[%c0_25, %c0_26], %32 {strides = array<i32>} : memref<16x128xbf16, #tpu.memory_space<vmem>>, vector<16x128xbf16>,
      %c0_27 = arith.constant 0 : index
      %c0_28 = arith.constant 0 : index
      %34 = vector.load %arg9[%c0_27, %c0_28] : memref<128x128xbf16, #tpu.memory_space<vmem>>, vector<128x128xbf16>
      %cst_29 = arith.constant dense<0.000000e+00> : vector<16x128xf32>
      %35 = tpu.matmul %32, %34, %cst_29 {dimension_numbers = #tpu.dot_dimension_numbers<[1], [0], [0], [1], [0, 0, 1, 1], [], []>} : vector<16x128xbf16>, vector<128x128xbf16>, vector<16x128xf32> -> vector<16x128xf32>
      %c0_30 = arith.constant 0 : index
      %c0_31 = arith.constant 0 : index
      %36 = vector.load %arg10[%c0_30, %c0_31] : memref<1x128xf32, #tpu.memory_space<vmem>>, vector<1x128xf32>
      %37 = vector.broadcast %36 : vector<1x128xf32> to vector<16x128xf32>
      %38 = arith.addf %35, %37 : vector<16x128xf32>
      %c0_32 = arith.constant 0 : index
      %c0_33 = arith.constant 0 : index
      %39 = vector.load %arg12[%c0_32, %c0_33] : memref<16x128xf32, #tpu.memory_space<vmem>>, vector<16x128xf32>
      tpu.vector_store %arg12[%c0_32, %c0_33], %38 {strides = array<i32>} : memref<16x128xf32, #tpu.memory_space<vmem>>, vector<16x128xf32>,
    } else {
    }
    return
  }
  func.func @transform_0(%arg0: i32, %arg1: i32) -> (i32, i32) {
    %c0_i32 = arith.constant 0 : i32
    return %arg0, %arg1 : i32, i32
  }
  func.func @transform_1(%arg0: i32, %arg1: i32) -> (i32, i32) {
    %c0_i32 = arith.constant 0 : i32
    %c0_i32_0 = arith.constant 0 : i32
    return %arg1, %c0_i32 : i32, i32
  }
  func.func @transform_2(%arg0: i32, %arg1: i32) -> (i32, i32) {
    %c0_i32 = arith.constant 0 : i32
    %c0_i32_0 = arith.constant 0 : i32
    %c0_i32_1 = arith.constant 0 : i32
    return %c0_i32, %c0_i32_0 : i32, i32
  }
  func.func @transform_3(%arg0: i32, %arg1: i32) -> (i32, i32) {
    %c0_i32 = arith.constant 0 : i32
    %c0_i32_0 = arith.constant 0 : i32
    %c0_i32_1 = arith.constant 0 : i32
    return %c0_i32, %c0_i32_0 : i32, i32
  }
  func.func @transform_4(%arg0: i32, %arg1: i32) -> (i32, i32) {
    %c0_i32 = arith.constant 0 : i32
    %c0_i32_0 = arith.constant 0 : i32
    %c0_i32_1 = arith.constant 0 : i32
    return %c0_i32, %c0_i32_0 : i32, i32
  }
  func.func @transform_5(%arg0: i32, %arg1: i32) -> (i32, i32) {
    %c0_i32 = arith.constant 0 : i32
    %c0_i32_0 = arith.constant 0 : i32
    %c0_i32_1 = arith.constant 0 : i32
    return %c0_i32, %c0_i32_0 : i32, i32
  }
  func.func @transform_6(%arg0: i32, %arg1: i32) -> (i32, i32) {
    %c0_i32 = arith.constant 0 : i32
    %c0_i32_0 = arith.constant 0 : i32
    %c0_i32_1 = arith.constant 0 : i32
    return %c0_i32, %c0_i32_0 : i32, i32
  }
  func.func @transform_7(%arg0: i32, %arg1: i32) -> (i32, i32) {
    %c0_i32 = arith.constant 0 : i32
    %c0_i32_0 = arith.constant 0 : i32
    %c0_i32_1 = arith.constant 0 : i32
    return %c0_i32, %c0_i32_0 : i32, i32
  }
  func.func @transform_8(%arg0: i32, %arg1: i32) -> (i32, i32) {
    %c0_i32 = arith.constant 0 : i32
    %c0_i32_0 = arith.constant 0 : i32
    %c0_i32_1 = arith.constant 0 : i32
    return %c0_i32, %c0_i32_0 : i32, i32
  }
  func.func @transform_9(%arg0: i32, %arg1: i32) -> (i32, i32) {
    %c0_i32 = arith.constant 0 : i32
    %c0_i32_0 = arith.constant 0 : i32
    return %arg0, %c0_i32 : i32, i32
  }
  func.func @transform_10(%arg0: i32, %arg1: i32) -> (i32, i32) {
    %c0_i32 = arith.constant 0 : i32
    %c0_i32_0 = arith.constant 0 : i32
    return %arg0, %c0_i32 : i32, i32
  }
}

</mosaic_0001>

<bundles_post_ra>
// kernel: _lambda_.1
= control target key start
LH: loop header
LB: loop body
LE: loop exit
PB: predicated region body
PF: predicated region fallthrough
CT: control target
= control target key end

     0   :  { %s2095_s0 = inlined_call_operand.vmem [shape: bf16[16,1024], index: 0, kind: input, shape index: {}]   ;;  %s2096_s1 = inlined_call_operand.hbm [shape: bf16[1024,128], index: 1, kind: input, shape index: {}]   ;;  %s2097_s2 = inlined_call_operand.vmem [shape: f32[1,128], index: 2, kind: input, shape index: {}]   ;;  %s2098_s3 = inlined_call_operand.vmem [shape: bf16[128,128], index: 3, kind: input, shape index: {}]   ;;  %s2099_s4 = inlined_call_operand.vmem [shape: f32[1,128], index: 4, kind: input, shape index: {}]   ;;  %s2100_s5 = inlined_call_operand.vmem [shape: bf16[128,128], index: 5, kind: input, shape index: {}]   ;;  %s2101_s6 = inlined_call_operand.vmem [shape: f32[1,128], index: 6, kind: input, shape index: {}]   ;;  %s2102_s7 = inlined_call_operand.vmem [shape: bf16[128,128], index: 7, kind: input, shape index: {}]   ;;  %s2103_s8 = inlined_call_operand.vmem [shape: f32[1,128], index: 8, kind: input, shape index: {}]   ;;  %s2104_s9 = inlined_call_operand.vmem [shape: bf16[16,128], index: 9, kind: output, shape index: {0}]   ;;  %s2105_s10 = inlined_call_operand.vmem [shape: f32[16,128], index: 10, kind: output, shape index: {1}]  }
   0x1   :  { %2106 = sst [smem:[#allocation7_spill]] %s2095_s0 }
   0x2   :  { %16 = vsyncpa [#allocation5], 0 }
   0x3   :  { %18 = vsyncpa [#allocation5 + $0x1], 0  ;;  %s1814_s13 = smov 0   ;;  %s1816_s14 = smov 0  }
   0x4   :  { %s1818_s15 = smov 0   ;;  %s1820_s16 = smov 0  }
   0x5   :  { %s1822_s17 = smov 0   ;;  %s1824_s18 = smov 0  }
   0x6 LB: > { %s1330_s19 = sadd.s32 4294967295, %s1751_s18   ;;  %s33_s20 = sadd.s32 1, %s1747_s17  ;;  %s1751_s18 = sphi %s1824_s18, %s24_s18   ;;  %s1747_s17 = sphi %s1822_s17, %s2114_s17   ;;  %s1743_s16 = sphi %s1820_s16, %s2113_s16   ;;  %s1739_s15 = sphi %s1818_s15, %s2112_s15   ;;  %s1735_s14 = sphi %s1816_s14, %s2111_s14   ;;  %s1731_s13 = sphi %s1814_s13, %s2110_s13  }
   0x7   : > { %p34_p0 = scmp.ge.s32.totalorder %s33_s20, 2  ;;  %s45_s21 = sadd.s32 1, %s1739_s15 }
   0x8   : > { %p52_p1 = scmp.ne.s32.totalorder %s1739_s15, %s1735_s14  ;;  %p53_p2 = scmp.eq.s32.totalorder %s1751_s18, 0 }
   0x9   : > { %s2116_s20 = smov (%p34_p0, %s33_s20), 0  ;;  %p84_p4 = scmp.ne.s32.totalorder %s1735_s14, %s1731_s13 }
   0xa   : > { %p1850_p3 = por %p53_p2, %p52_p1  ;;  %s41_s23 = ssub.s32 %s1747_s17, %s2116_s20 }
   0xb   : > { %p85_p5 = scmp.eq.s32.totalorder %s1330_s19, 0  ;;  %p43_p6 = scmp.eq.s32.totalorder %s41_s23, 0 }
   0xc   : > { %p1332_p8 = scmp.ge.s32.totalorder %s1751_s18, 2 }
   0xd   : > { %p1857_p7 = por %p85_p5, %p84_p4 }
   0xe   : > { %s1862_s25 = scalar_select %p43_p6, %s1739_s15, %s45_s21  }
   0xf   : > { %324 = sbr.rel (%p1332_p8) target bundleno = 60 (0x3c), region = 44 }
  0x16   : > { %327 = sbr.rel (!%p1850_p3) target bundleno = 34 (0x22), region = 48  ;;  %s329_s26 = sand.u32 (%p1850_p3), 1, %s1739_s15  }
  0x17   : > { %s1416_s27 = sshll.u32 (%p1850_p3), %s1747_s17, 4  ;;  %s1333_s28 = sshll.u32 (%p1850_p3), %s329_s26, 5 }
  0x18   : > { %s2109_s0 = sld [smem:[#allocation7_spill]] (%p1850_p3)  ;;  %s331_s12 = scalar_lea.vmem (%p1850_p3), [#allocation3], %s1333_s28 }
  0x1e   : > { %s337_s11 = scalar_lea.vmem %s2109_s0, %s1416_s27 }
  0x1f   : > { %v350_v0 = vld [vmem:[%s337_s11] sm:$0xff]  ;;  %v352_v1 = vld [vmem:[%s337_s11 + $0x8] sm:$0xff] }
  0x20   : > { %v354_v2 = vld [vmem:[%s337_s11 + $0x20] sm:$0xff]  ;;  %351 = vst [vmem:[%s331_s12] sm:$0xff] %v350_v0  ;;  %353 = vst [vmem:[%s331_s12 + $0x8] sm:$0xff] %v352_v1  ;;  %v356_v3 = vld [vmem:[%s337_s11 + $0x28] sm:$0xff] }
  0x21   : > { %355 = vst [vmem:[%s331_s12 + $0x10] sm:$0xff] %v354_v2  ;;  %357 = vst [vmem:[%s331_s12 + $0x18] sm:$0xff] %v356_v3 }
  0x22 PF: > { %s364_s13 = sand.u32 1, %s1739_s15   ;;  %s1417_s19 = sshll.u32 %s1747_s17, 12 }
  0x23   : > { %s1336_s21 = sshll.u32 %s364_s13, 8  ;;  %s1877_s27 = scalar_lea.hbm %s2096_s1, %s1417_s19 }
  0x24   : > { %s368_s28 = scalar_lea.vmem [#allocation4], %s1336_s21  ;;  %s1881_s30 = scalar_lea.sflag [#allocation5], %s364_s13 }
  0x25   : > { %s375_s29 = sshll.u32 %s368_s28, 4  ;;  %s1673_s11 = scalar_lea.hbm %s1877_s27, 4096  ;;  %s1879_s29 = int_to_ptr.vmem [resolvable:$true] %s375_s29 }
  0x26   : > { %p1674_p9 = scmp.ne.s32.totalorder %s1877_s27, %s1673_s11  ;;  %s1677_s19 = scalar_lea.hbm %s2096_s1, 8192 }
  0x27   : > { %p1678_p12 = scmp.lt.u32.totalorder %s1877_s27, %s2096_s1  ;;  %p1679_p13 = scmp.lt.u32.totalorder %s1677_s19, %s1673_s11 }
  0x28   : > { %p1675_p10 = pnand %p1674_p9, %p1850_p3  ;;  %p1681_p1 = scmp.lt.u32.totalorder %s1673_s11, %s1877_s27 }
  0x29   : > { %p1680_p0 = por %p1679_p13, %p1678_p12 }
  0x2a   : > { %p1676_p11 = pneg %p1675_p10 }
  0x2b   : > { %p1682_p2 = por %p1681_p1, %p1680_p0 }
  0x2d   : > { %p1683_p4 = pnand %p1682_p2, %p1676_p11 }
  0x2f   : > { %1686 = shalt.err (!%p1683_p4)
}
  0x30   : > { %s1687_s13 = scalar_lea.vmem %s1879_s29, 4096  ;;  %s1753_s0 = smov [#allocation4]  }
  0x31   : > { %p1688_p5 = scmp.ne.s32.totalorder %s1879_s29, %s1687_s13  ;;  %s1691_s21 = sshll.u32 %s1753_s0, 4  ;;  %s1692_s21 = int_to_ptr.vmem [resolvable:$false] %s1691_s21 }
  0x32   : > { %s1693_s28 = scalar_lea.vmem %s1692_s21, 8192  ;;  %p1694_p9 = scmp.lt.s32.totalorder %s1879_s29, %s1692_s21 }
  0x33   : > { %p1689_p6 = pnand %p1688_p5, %p1850_p3  ;;  %p1695_p10 = scmp.lt.s32.totalorder %s1693_s28, %s1687_s13 }
  0x35   : > { %p1690_p8 = pneg %p1689_p6  ;;  %p1696_p12 = por %p1695_p10, %p1694_p9 }
  0x37   : > { %p1697_p13 = pnand %p1696_p12, %p1690_p8 }
  0x39   : > { %1700 = shalt.err (!%p1697_p13)
}
  0x3a   : > { %s1754_s11 = smov 64   ;;  %s1755_s12 = smov 4  }
  0x3b   : > { %1556 = dma.hbm_to_vmem [thread:$0]  (%p1850_p3), %s1877_s27, 4096, %s1879_s29, %s1881_s30, %s1754_s11, %s1754_s11, %s1755_s12  }
  0x3c PF: > { %p1339_p11 = scmp.ge.s32.totalorder %s1751_s18, 1  ;;  %p383_p0 = scmp.lt.s32.totalorder %s1751_s18, 3 }
  0x3e   : > { %p384_p1 = pnand %p1339_p11, %p383_p0 }
  0x3f   : > { %s390_s19 = sand.u32 (!%p384_p1), 1, %s1735_s14  }
  0x40   : > { %387 = sbr.rel (%p384_p1) target bundleno = 1006 (0x3ee), region = 75  ;;  %s1340_s23 = sshll.u32 (!%p384_p1), %s390_s19, 5 }
  0x41   : > { %s1341_s26 = sshll.u32 (!%p384_p1), %s390_s19, 8  ;;  %s1908_s13 = scalar_lea.vmem (!%p384_p1), [#allocation3], %s1340_s23 }
  0x42   : > { %s397_s0 = scalar_lea.sflag (!%p384_p1), [#allocation5], %s390_s19  ;;  %s1910_s21 = scalar_lea.vmem (!%p384_p1), [#allocation4], %s1341_s26 }
  0x47   : > { %1726 = dma.done.wait (%p1857_p7), %s397_s0, 4096  }
  0x48   : > { %1728 = vsyncadd (%p1857_p7), %s397_s0, 4294963200  ;;  %p1342_p3 = scmp.ne.s32.totalorder %s1743_s16, 0 }
  0x49   : > { %v1756_v4 = vmov (!%p1342_p3), 0.0  }
  0x4a   : > { %465 = sbr.rel (%p1342_p3) target bundleno = 81 (0x51), region = 87  ;;  %466 = vst [vmem:[#allocation2] sm:$0xff] (!%p1342_p3), %v1756_v4  ;;  %467 = vst [vmem:[#allocation2 + $0x8] sm:$0xff] (!%p1342_p3), %v1756_v4 }
  0x51 PF: > { %v1611_v5 = vld [vmem:[%s1910_s21 + $0x40] sm:$0xff]   ;;  %v1615_v9 = vld [vmem:[%s1910_s21 + $0x48] sm:$0xff]   ;;  %v1619_v13 = vld [vmem:[%s1910_s21 + $0x50] sm:$0xff]   ;;  %p1379_p7 = scmp.ne.s32.totalorder %s1743_s16, 1 }
  0x52   : > { %v1612_v6 = vld [vmem:[%s1910_s21 + $0xc0] sm:$0xff]   ;;  %1425 = vmatprep.subr.bf16.mxu0 %v1611_v5  ;;  %v1616_v10 = vld [vmem:[%s1910_s21 + $0xc8] sm:$0xff]   ;;  %v1620_v14 = vld [vmem:[%s1910_s21 + $0xd0] sm:$0xff]   ;;  %v1757_v60 = vmov (!%p1379_p7), 0.0   ;;  %vm1758_vm0 = vmmov (!%p1379_p7), 0  }
  0x53   : > { %v1613_v7 = vld [vmem:[%s1910_s21] sm:$0xff]   ;;  %1447 = vmatprep.subr.bf16.mxu1 %v1612_v6  ;;  %v1617_v11 = vld [vmem:[%s1910_s21 + $0x8] sm:$0xff]   ;;  %v1621_v15 = vld [vmem:[%s1910_s21 + $0x10] sm:$0xff]  }
  0x54   : > { %v1614_v8 = vld [vmem:[%s1910_s21 + $0x80] sm:$0xff]   ;;  %1426 = vmatpush3.bf16.msra.mxu0 %v1613_v7  ;;  %v1618_v12 = vld [vmem:[%s1910_s21 + $0x88] sm:$0xff]   ;;  %v1622_v16 = vld [vmem:[%s1910_s21 + $0x90] sm:$0xff]  }
  0x55   : > { %1448 = vmatpush3.bf16.msra.mxu1 %v1614_v8  ;;  %1427 = vmatprep.subr.bf16.mxu0 %v1615_v9  ;;  %v1623_v17 = vld [vmem:[%s1910_s21 + $0x58] sm:$0xff]   ;;  %v1627_v21 = vld [vmem:[%s1910_s21 + $0x60] sm:$0xff]   ;;  %v1631_v25 = vld [vmem:[%s1910_s21 + $0x68] sm:$0xff]  }
  0x56   : > { %1449 = vmatprep.subr.bf16.mxu1 %v1616_v10  ;;  %v1624_v18 = vld [vmem:[%s1910_s21 + $0xd8] sm:$0xff]   ;;  %v1628_v22 = vld [vmem:[%s1910_s21 + $0xe0] sm:$0xff]   ;;  %v1632_v26 = vld [vmem:[%s1910_s21 + $0xe8] sm:$0xff]  }
  0x57   : > { %v1625_v19 = vld [vmem:[%s1910_s21 + $0x18] sm:$0xff]   ;;  %v1629_v23 = vld [vmem:[%s1910_s21 + $0x20] sm:$0xff]   ;;  %v1633_v27 = vld [vmem:[%s1910_s21 + $0x28] sm:$0xff]  }
  0x58   : > { %1428 = vmatpush3.bf16.msra.mxu0 %v1617_v11  ;;  %v1626_v20 = vld [vmem:[%s1910_s21 + $0x98] sm:$0xff]   ;;  %v1630_v24 = vld [vmem:[%s1910_s21 + $0xa0] sm:$0xff]   ;;  %v1634_v28 = vld [vmem:[%s1910_s21 + $0xa8] sm:$0xff]  }
  0x59   : > { %1450 = vmatpush3.bf16.msra.mxu1 %v1618_v12  ;;  %1429 = vmatprep.subr.bf16.mxu0 %v1619_v13  ;;  %v1635_v29 = vld [vmem:[%s1910_s21 + $0x70] sm:$0xff]   ;;  %v1639_v33 = vld [vmem:[%s1910_s21 + $0x78] sm:$0xff]   ;;  %v1651_v62 = vld [vmem:[%s2098_s3 + $0x10] sm:$0xff] (!%p1379_p7)  }
  0x5a   : > { %1451 = vmatprep.subr.bf16.mxu1 %v1620_v14  ;;  %v1636_v30 = vld [vmem:[%s1910_s21 + $0xf0] sm:$0xff]   ;;  %v1640_v34 = vld [vmem:[%s1910_s21 + $0xf8] sm:$0xff]   ;;  %v1652_v0 = vld [vmem:[%s2098_s3 + $0x18] sm:$0xff] (!%p1379_p7)  }
  0x5b   : > { %v1637_v31 = vld [vmem:[%s1910_s21 + $0x30] sm:$0xff]   ;;  %v1641_v35 = vld [vmem:[%s1910_s21 + $0x38] sm:$0xff]   ;;  %v1659_v3 = vld [vmem:[%s2100_s5 + $0x10] sm:$0xff] (!%p1379_p7)  }
  0x5c   : > { %1430 = vmatpush3.bf16.msra.mxu0 %v1621_v15  ;;  %v1638_v32 = vld [vmem:[%s1910_s21 + $0xb0] sm:$0xff]   ;;  %v1642_v36 = vld [vmem:[%s1910_s21 + $0xb8] sm:$0xff]   ;;  %v1660_v8 = vld [vmem:[%s2100_s5 + $0x18] sm:$0xff] (!%p1379_p7)  }
  0x5d   : > { %1452 = vmatpush3.bf16.msra.mxu1 %v1622_v16  ;;  %1431 = vmatprep.subr.bf16.mxu0 %v1623_v17  ;;  %v1643_v37 = vld [vmem:[%s1908_s13] ss:$16 sps:$4 sm:$0xff]   ;;  %v1645_v38 = vld [vmem:[%s1908_s13 + $0x4] ss:$16 sps:$4 sm:$0xff]   ;;  %v1646_v39 = vld [vmem:[%s1908_s13 + $0x8] ss:$16 sps:$4 sm:$0xff]  }
  0x5e   : > { %1453 = vmatprep.subr.bf16.mxu1 %v1624_v18  ;;  %v1648_v40 = vld [vmem:[%s1908_s13 + $0xc] ss:$16 sps:$4 sm:$0xff]   ;;  %782 = vmatprep.mubr.bf16.mxu0 %v1645_v38  ;;  %v468_v50 = vld [vmem:[#allocation2] sm:$0xff]  ;;  %v1655_v11 = vld [vmem:[%s2098_s3 + $0x30] sm:$0xff] (!%p1379_p7)  }
  0x5f   : > { %823 = vmatprep.mubr.bf16.mxu1 %v1648_v40  ;;  %v469_v55 = vld [vmem:[#allocation2 + $0x8] sm:$0xff]  ;;  %v1649_v59 = vld [vmem:[%s2098_s3] sm:$0xff] (!%p1379_p7)   ;;  %v1656_v15 = vld [vmem:[%s2098_s3 + $0x38] sm:$0xff] (!%p1379_p7)  }
  0x60   : > { %1432 = vmatpush3.bf16.msra.mxu0 %v1625_v19  ;;  %v1650_v61 = vld [vmem:[%s2098_s3 + $0x8] sm:$0xff] (!%p1379_p7)   ;;  %v1657_v63 = vld [vmem:[%s2100_s5] sm:$0xff] (!%p1379_p7)   ;;  %v1663_v18 = vld [vmem:[%s2100_s5 + $0x30] sm:$0xff] (!%p1379_p7)  }
  0x61   : > { %1454 = vmatpush3.bf16.msra.mxu1 %v1626_v20  ;;  %1433 = vmatprep.subr.bf16.mxu0 %v1627_v21  ;;  %v1658_v1 = vld [vmem:[%s2100_s5 + $0x8] sm:$0xff] (!%p1379_p7)   ;;  %v1653_v2 = vld [vmem:[%s2098_s3 + $0x20] sm:$0xff] (!%p1379_p7)   ;;  %v1664_v19 = vld [vmem:[%s2100_s5 + $0x38] sm:$0xff] (!%p1379_p7)  }
  0x62   : > { %1455 = vmatprep.subr.bf16.mxu1 %v1628_v22  ;;  %v1654_v4 = vld [vmem:[%s2098_s3 + $0x28] sm:$0xff] (!%p1379_p7)   ;;  %v1380_v7 = vld [vmem:[%s2097_s2] ss:$0 sm:$0xff] (!%p1379_p7)  ;;  %v1667_v22 = vld [vmem:[%s2102_s7 + $0x10] sm:$0xff] (!%p1379_p7)  }
  0x63   : > { %v1661_v12 = vld [vmem:[%s2100_s5 + $0x20] sm:$0xff] (!%p1379_p7)   ;;  %v1662_v16 = vld [vmem:[%s2100_s5 + $0x28] sm:$0xff] (!%p1379_p7)  }
  0x64   : > { %1434 = vmatpush3.bf16.msra.mxu0 %v1629_v23  ;;  %v1665_v20 = vld [vmem:[%s2102_s7] sm:$0xff] (!%p1379_p7)   ;;  %v1666_v21 = vld [vmem:[%s2102_s7 + $0x8] sm:$0xff] (!%p1379_p7)   ;;  %v1668_v23 = vld [vmem:[%s2102_s7 + $0x18] sm:$0xff] (!%p1379_p7)  }
  0x65   : > { %1456 = vmatpush3.bf16.msra.mxu1 %v1630_v24  ;;  %1435 = vmatprep.subr.bf16.mxu0 %v1631_v25  ;;  %v1669_v24 = vld [vmem:[%s2102_s7 + $0x20] sm:$0xff] (!%p1379_p7)   ;;  %v1670_v25 = vld [vmem:[%s2102_s7 + $0x28] sm:$0xff] (!%p1379_p7)  }
  0x66   : > { %1457 = vmatprep.subr.bf16.mxu1 %v1632_v26  ;;  %v1381_v26 = vld [vmem:[%s2099_s4] ss:$0 sm:$0xff] (!%p1379_p7) }
  0x67   : > { %v1390_v38 = vld [vmem:[%s2101_s6] ss:$0 sm:$0xff] (!%p1379_p7) }
  0x68   : > { %1436 = vmatpush3.bf16.msra.mxu0 %v1633_v27 }
  0x69   : > { %1458 = vmatpush3.bf16.msra.mxu1 %v1634_v28  ;;  %1437 = vmatprep.subr.bf16.mxu0 %v1635_v29 }
  0x6a   : > { %1459 = vmatprep.subr.bf16.mxu1 %v1636_v30 }
  0x6c   : > { %1438 = vmatpush3.bf16.msra.mxu0 %v1637_v31 }
  0x6d   : > { %1460 = vmatpush3.bf16.msra.mxu1 %v1638_v32  ;;  %1439 = vmatprep.subr.bf16.mxu0 %v1639_v33 }
  0x6e   : > { %1461 = vmatprep.subr.bf16.mxu1 %v1640_v34 }
  0x70   : > { %1440 = vmatpush3.bf16.msra.mxu0 %v1641_v35 }
  0x71   : > { %1462 = vmatpush3.bf16.msra.mxu1 %v1642_v36  ;;  %1496 = vmatprep.subr.bf16.mxu0 (!%p1379_p7), %v1757_v60  ;;  %v1671_v36 = vld [vmem:[%s2102_s7 + $0x30] sm:$0xff] (!%p1379_p7)  }
  0x72   : > { %1516 = vmatprep.subr.bf16.mxu1 (!%p1379_p7), %v1757_v60 }
  0x73   : > { %783 = vmatmul.mubr.bf16.vlgmr.msra.gmra.mrb[0].mxu0 %v1643_v37  ;;  %v1672_v37 = vld [vmem:[%s2102_s7 + $0x38] sm:$0xff] (!%p1379_p7)  }
  0x74   : > { %824 = vmatmul.mubr.bf16.vlgmr.msra.gmra.mrb[0].mxu1 %v1646_v39  ;;  %1497 = vmatpush3.bf16.msra.mxu0 (!%p1379_p7), %v1649_v59 }
  0x75   : > { %1512 = vmatprep.mubr.msk.bf16.mxu0 (!%p1379_p7), %vm1758_vm0, %v1757_v60  ;;  %1498 = vmatprep.subr.bf16.mxu0 (!%p1379_p7), %v1757_v60 }
  0x76   : > { %1532 = vmatprep.mubr.msk.bf16.mxu1 (!%p1379_p7), %vm1758_vm0, %v1757_v60  ;;  %1517 = vmatpush3.bf16.msra.mxu1 (!%p1379_p7), %v1657_v63 }
  0x77   : > { %1518 = vmatprep.subr.bf16.mxu1 (!%p1379_p7), %v1757_v60 }
  0x78   : > { %1499 = vmatpush3.bf16.msra.mxu0 (!%p1379_p7), %v1650_v61 }
  0x79   : > { %1500 = vmatprep.subr.bf16.mxu0 (!%p1379_p7), %v1757_v60 }
  0x7a   : > { %1519 = vmatpush3.bf16.msra.mxu1 (!%p1379_p7), %v1658_v1 }
  0x7b   : > { %1520 = vmatprep.subr.bf16.mxu1 (!%p1379_p7), %v1757_v60 }
  0x7c   : > { %1501 = vmatpush3.bf16.msra.mxu0 (!%p1379_p7), %v1651_v62 }
  0x7d   : > { %1502 = vmatprep.subr.bf16.mxu0 (!%p1379_p7), %v1757_v60 }
  0x7e   : > { %1521 = vmatpush3.bf16.msra.mxu1 (!%p1379_p7), %v1659_v3 }
  0x7f   : > { %1522 = vmatprep.subr.bf16.mxu1 (!%p1379_p7), %v1757_v60 }
  0x80   : > { %1503 = vmatpush3.bf16.msra.mxu0 (!%p1379_p7), %v1652_v0 }
  0x81   : > { %1504 = vmatprep.subr.bf16.mxu0 (!%p1379_p7), %v1757_v60 }
  0x82   : > { %1523 = vmatpush3.bf16.msra.mxu1 (!%p1379_p7), %v1660_v8 }
  0x83   : > { %1524 = vmatprep.subr.bf16.mxu1 (!%p1379_p7), %v1757_v60 }
  0x84   : > { %1505 = vmatpush3.bf16.msra.mxu0 (!%p1379_p7), %v1653_v2 }
  0x85   : > { %1506 = vmatprep.subr.bf16.mxu0 (!%p1379_p7), %v1757_v60 }
  0x86   : > { %1525 = vmatpush3.bf16.msra.mxu1 (!%p1379_p7), %v1661_v12 }
  0x87   : > { %1526 = vmatprep.subr.bf16.mxu1 (!%p1379_p7), %v1757_v60 }
  0x88   : > { %1507 = vmatpush3.bf16.msra.mxu0 (!%p1379_p7), %v1654_v4 }
  0x89   : > { %1508 = vmatprep.subr.bf16.mxu0 (!%p1379_p7), %v1757_v60 }
  0x8a   : > { %1527 = vmatpush3.bf16.msra.mxu1 (!%p1379_p7), %v1662_v16 }
  0x8b   : > { %1528 = vmatprep.subr.bf16.mxu1 (!%p1379_p7), %v1757_v60 }
  0x8c   : > { %1509 = vmatpush3.bf16.msra.mxu0 (!%p1379_p7), %v1655_v11 }
  0x8d   : > { %1510 = vmatprep.subr.bf16.mxu0 (!%p1379_p7), %v1757_v60 }
  0x8e   : > { %1529 = vmatpush3.bf16.msra.mxu1 (!%p1379_p7), %v1663_v18 }
  0x8f   : > { %1530 = vmatprep.subr.bf16.mxu1 (!%p1379_p7), %v1757_v60 }
  0x90   : > { %1511 = vmatpush3.bf16.msra.mxu0 (!%p1379_p7), %v1656_v15 }
  0x91   : > { %1536 = vmatprep.subr.bf16.mxu0 (!%p1379_p7), %v1757_v60 }
  0x92   : > { %1531 = vmatpush3.bf16.msra.mxu1 (!%p1379_p7), %v1664_v19 }
 0x146   : > { %v1441_v41 = vpop.f32.mrb[0].mxu0 }
 0x147   : > { %v1463_v42 = vpop.f32.mrb[0].mxu1  ;;  %v1442_v43 = vpop.f32.mrb[1].mxu0 }
 0x148   : > { %v1443_v44 = vadd.f32 %v1442_v43, %v1441_v41  ;;  %v1464_v45 = vpop.f32.mrb[1].mxu1  ;;  %v1444_v46 = vpop.f32.mrb[2].mxu0 }
 0x149   : > { %v1465_v47 = vadd.f32 %v1464_v45, %v1463_v42  ;;  %v1466_v48 = vpop.f32.mrb[2].mxu1  ;;  %v1445_v49 = vpop.f32.mrb[3].mxu0 }
 0x14a   : > { %v1446_v51 = vadd.f32 %v1445_v49, %v1444_v46  ;;  %v1467_v52 = vpop.f32.mrb[3].mxu1  ;;  %v1401_v46 = vld [vmem:[%s2103_s8] ss:$0 sm:$0xff] (!%p1379_p7) }
 0x14b   : > { %v826_v53 = vadd.f32 %v1465_v47, %v1443_v44  ;;  %v1468_v54 = vadd.f32 %v1467_v52, %v1466_v48  ;;  %839 = sbr.rel (%p1379_p7) target bundleno = 1006 (0x3ee), region = 91 }
 0x14d   : > { %v832_v56 = vadd.f32 %v826_v53, %v468_v50  ;;  %v829_v57 = vadd.f32 %v1468_v54, %v1446_v51 }
 0x14f   : > { %834 = vst [vmem:[#allocation2] sm:$0xff] %v832_v56  ;;  %v833_v58 = vadd.f32 %v829_v57, %v469_v55 }
 0x151   : > { %835 = vst [vmem:[#allocation2 + $0x8] sm:$0xff] %v833_v58 }
 0x156   : > { %v840_v5 = vld [vmem:[#allocation2] sm:$0xff] }
 0x157   : > { %v849_v9 = vadd.f32 %v1380_v7, %v840_v5 }
 0x158   : > { %v841_v6 = vld [vmem:[#allocation2 + $0x8] sm:$0xff] }
 0x159   : > { %v850_v10 = vadd.f32 %v1380_v7, %v841_v6  ;;  %v851_v13 = vmax.f32 %v849_v9, 0.0 }
 0x15b   : > { %v852_v14 = vmax.f32 %v850_v10, 0.0 }
 0x15d   : > { %v853_v17 = vpack.c.bf16 %v852_v14, %v851_v13 }
 0x15f   : > { %1513 = vmatmul.mubr.bf16.vlgmr.msra.gmra.mrb[0].mxu0 %v853_v17 }
 0x160   : > { %1552 = vmatprep.mubr.msk.bf16.mxu0 %vm1758_vm0, %v1757_v60  ;;  %1537 = vmatpush3.bf16.msra.mxu0 %v1665_v20 }
 0x161   : > { %1538 = vmatprep.subr.bf16.mxu0 %v1757_v60 }
 0x164   : > { %1539 = vmatpush3.bf16.msra.mxu0 %v1666_v21 }
 0x165   : > { %1540 = vmatprep.subr.bf16.mxu0 %v1757_v60 }
 0x168   : > { %1541 = vmatpush3.bf16.msra.mxu0 %v1667_v22 }
 0x169   : > { %1542 = vmatprep.subr.bf16.mxu0 %v1757_v60 }
 0x16c   : > { %1543 = vmatpush3.bf16.msra.mxu0 %v1668_v23 }
 0x16d   : > { %1544 = vmatprep.subr.bf16.mxu0 %v1757_v60 }
 0x170   : > { %1545 = vmatpush3.bf16.msra.mxu0 %v1669_v24 }
 0x171   : > { %1546 = vmatprep.subr.bf16.mxu0 %v1757_v60 }
 0x174   : > { %1547 = vmatpush3.bf16.msra.mxu0 %v1670_v25 }
 0x175   : > { %1548 = vmatprep.subr.bf16.mxu0 %v1757_v60 }
 0x178   : > { %1549 = vmatpush3.bf16.msra.mxu0 %v1671_v36 }
 0x179   : > { %1550 = vmatprep.subr.bf16.mxu0 %v1757_v60 }
 0x17c   : > { %1551 = vmatpush3.bf16.msra.mxu0 %v1672_v37 }
 0x232   : > { %v959_v27 = vpop.f32.mrb[0].mxu0 }
 0x233   : > { %v960_v28 = vadd.f32 %v1381_v26, %v959_v27  ;;  %v1514_v29 = vpop.f32.mrb[1].mxu0 }
 0x234   : > { %v962_v30 = vpop.f32.mrb[2].mxu0 }
 0x235   : > { %v963_v31 = vadd.f32 %v1381_v26, %v962_v30  ;;  %v1515_v32 = vpop.f32.mrb[3].mxu0  ;;  %v966_v33 = vmax.f32 %v960_v28, 0.0 }
 0x237   : > { %v967_v34 = vmax.f32 %v963_v31, 0.0 }
 0x239   : > { %v968_v35 = vpack.c.bf16 %v967_v34, %v966_v33 }
 0x23b   : > { %1533 = vmatmul.mubr.bf16.vlgmr.msra.gmra.mrb[0].mxu1 %v968_v35 }
 0x30e   : > { %v1074_v39 = vpop.f32.mrb[0].mxu1 }
 0x30f   : > { %v1534_v40 = vpop.f32.mrb[1].mxu1  ;;  %v1075_v42 = vadd.f32 %v1390_v38, %v1074_v39 }
 0x310   : > { %v1077_v41 = vpop.f32.mrb[2].mxu1 }
 0x311   : > { %v1078_v43 = vadd.f32 %v1390_v38, %v1077_v41  ;;  %v1535_v44 = vpop.f32.mrb[3].mxu1 }
 0x313   : > { %v1081_v45 = vpack.c.bf16 %v1078_v43, %v1075_v42 }
 0x315   : > { %1424 = vst [vmem:[%s2104_s9] sm:$0xff] %v1081_v45   ;;  %1553 = vmatmul.mubr.bf16.vlgmr.msra.gmra.mrb[4].mxu0 %v1081_v45 }
 0x3e8   : > { %v1196_v47 = vpop.f32.mrb[4].mxu0 }
 0x3e9   : > { %v1197_v48 = vadd.f32 %v1401_v46, %v1196_v47  ;;  %v1554_v49 = vpop.f32.mrb[5].mxu0 }
 0x3ea   : > { %v1199_v50 = vpop.f32.mrb[6].mxu0 }
 0x3eb   : > { %1203 = vst [vmem:[%s2105_s10] sm:$0xff] %v1197_v48  ;;  %v1200_v51 = vadd.f32 %v1401_v46, %v1199_v50  ;;  %v1555_v52 = vpop.f32.mrb[7].mxu0 }
 0x3ed   : > { %1204 = vst [vmem:[%s2105_s10 + $0x8] sm:$0xff] %v1200_v51 }
 0x3ee PF: > { %s24_s18 = sadd.s32 1, %s1751_s18   ;;  %s2110_s13 = smov %s1735_s14 }
 0x3ef   : > { %p21_p2 = scmp.ge.s32.totalorder %s24_s18, 4   ;;  %s2111_s14 = smov %s1739_s15 }
 0x3f0   : > { %s2112_s15 = smov %s1862_s25  ;;  %s2113_s16 = smov %s1747_s17 }
 0x3f1   : > { %s2114_s17 = smov %s2116_s20  ;;  %23 = sbr.rel (!%p21_p2) target bundleno = 6 (0x6), region = 147 }
 0x3f8   :  { %1244 = vsyncpa [#allocation5], 1 }
 0x3f9   :  { %1246 = vsyncpa [#allocation5 + $0x1], 1 }

</bundles_post_ra>
